<compile_context>
chip_gen: v6e
topology: v6e:2x2x1
jax: 0.10.0
libtpu: 0.0.40
codegen_flags: <defaults>
</compile_context>

<pallas_src>
import functools

import jax
import jax.numpy as jnp
from jax import lax
from jax.experimental import pallas as pl
from jax.experimental.pallas import tpu as pltpu

_EPS = 1e-5
_LEAKY_SLOPE = 0.01  # nn.LeakyReLU default


def _up_kernel(x_ref, t_ref, b_ref, o_ref, *, c_out, l_out, apply_norm_act, precision):
    # x_ref: (TB, C_in*L_in)            lane-dense input rows (raw x, no dilation/padding)
    # t_ref: (C_in*L_in, C_out*L_out)   folded ConvTranspose1d matrix (constant block, resident)
    # b_ref: (1, C_out*L_out)           bias pre-broadcast over L
    # o_ref: (TB, C_out*L_out)          lane-dense output rows
    h = jnp.dot(x_ref[...], t_ref[...],
                preferred_element_type=jnp.float32,
                precision=precision)                      # one 2-D MXU matmul per grid step
    h = h + b_ref[...]

    if apply_norm_act:
        tb = h.shape[0]
        # Split the 128-wide lane dim into (C_out, L_out) just for the norm statistics;
        # stats are exact f32 VPU/XLU math (biased variance, as in InstanceNorm1d).
        h3 = h.reshape(tb, c_out, l_out)
        mean = jnp.mean(h3, axis=-1, keepdims=True)
        d = h3 - mean
        var = jnp.mean(d * d, axis=-1, keepdims=True)
        hn = d * lax.rsqrt(var + _EPS)
        hn = jnp.where(hn > 0, hn, _LEAKY_SLOPE * hn)     # LeakyReLU(0.01)
        h = hn.reshape(tb, c_out * l_out)                 # back to lane-dense for an unmasked store

    o_ref[...] = h.astype(o_ref.dtype)


def _pad_to(v, m):
    return ((v + m - 1) // m) * m


def _vmem_capacity_bytes():
    try:
        return int(pltpu.get_tpu_info().vmem_capacity_bytes)
    except Exception:
        return 64 * 1024 * 1024        # conservative default = v7x per-TensorCore VMEM


def _num_tensorcores():
    try:
        dev = jax.devices()[0]
        for attr in ("num_cores", "core_count"):
            v = getattr(dev, attr, None)
            if v:
                return max(1, int(v))
    except Exception:
        pass
    return 1


def _choose_batch_tile(n, in_row_elems, out_row_elems, resident_bytes, vmem_cap,
                       num_cores, in_itemsize):
    """Largest batch tile whose padded, double-buffered VMEM footprint fits the budget."""
    in_row_b = _pad_to(in_row_elems, 128) * in_itemsize
    out_row_b = _pad_to(out_row_elems, 128) * 4            # output block + temporaries are f32
    # 2x buffers for the input block, 2x for the output block, plus roughly two
    # output-sized f32 live temporaries inside the kernel body (norm math).
    per_row = 2 * in_row_b + 2 * out_row_b + 2 * out_row_b
    budget = max(vmem_cap // 2 - 2 * resident_bytes, 2 * 1024 * 1024)
    cap = max(1, budget // per_row)
    tb = min(n, cap)
    if num_cores > 1:
        # Multi-TensorCore parts (v7x): keep >= num_cores grid steps so the "parallel"
        # batch axis load-balances.  Single-TC parts (v5e/v6e) skip this and simply take
        # the largest block that fits (no forced splitting / per-step overhead).
        tb = min(tb, max(1, -(-n // num_cores)))
    if tb >= n:
        return n                    # one full block (block dim == array dim is always legal)
    tb8 = (tb // 8) * 8             # keep the batch (sublane) block dim 8-aligned
    return tb8 if tb8 >= 8 else min(n, 8)


def up_forward(x, weight, bias, *, stride, padding, last=False, io_dtype=jnp.float32):
    """Forward pass of `Up`.

    x:      (N, C_in, L_in)   float32, PyTorch NCL layout
    weight: (C_in, C_out, K)  PyTorch ConvTranspose1d weight
    bias:   (C_out,)
    io_dtype: dtype used for the x / folded-weight operands of the MXU matmul
              (jnp.bfloat16 halves HBM/VMEM bytes; numerics then are bf16-level).
    """
    n, c_in, l_in = x.shape
    assert weight.shape[0] == c_in
    c_out, k = weight.shape[1], weight.shape[2]
    l_out = (l_in - 1) * stride - 2 * padding + k
    assert l_out >= 1, "invalid ConvTranspose1d geometry"

    io_dtype = jnp.dtype(io_dtype)

    # --- Fold the transposed conv into one dense matrix (tiny; built per call) -----
    #   T[ci*L_in + i, co*L_out + j] = W[ci, co, j + padding - i*stride]  (0 when tap OOB)
    w32 = weight.astype(jnp.float32)
    tap = (jnp.arange(l_out)[None, :] + padding) - jnp.arange(l_in)[:, None] * stride  # (L_in, L_out)
    valid = (tap >= 0) & (tap < k)
    taps = jnp.where(valid[None, None], w32[:, :, jnp.clip(tap, 0, k - 1)], 0.0)       # (C_in, C_out, L_in, L_out)
    t_mat = jnp.transpose(taps, (0, 2, 1, 3)).reshape(c_in * l_in, c_out * l_out).astype(io_dtype)
    bias_flat = jnp.broadcast_to(bias.astype(jnp.float32)[:, None],
                                 (c_out, l_out)).reshape(1, c_out * l_out)

    # Free row-major merge: x2d[b, ci*L_in + i] = x[b, ci, i].  No dilation, no edge pad.
    x2d = x.reshape(n, c_in * l_in).astype(io_dtype)

    # --- Tile the batch axis (padded, double-buffered VMEM accounting) -------------
    vmem_cap = _vmem_capacity_bytes()
    cores = _num_tensorcores()
    resident = (_pad_to(c_in * l_in, 8) * _pad_to(c_out * l_out, 128) * io_dtype.itemsize
                + 8 * _pad_to(c_out * l_out, 128) * 4)     # T + bias (lane/sublane padded)
    tb = _choose_batch_tile(n, c_in * l_in, c_out * l_out, resident, vmem_cap, cores,
                            io_dtype.itemsize)
    steps = pl.cdiv(n, tb)
    n_pad = steps * tb
    if n_pad != n:
        x2d = jnp.pad(x2d, ((0, n_pad - n), (0, 0)))       # zero rows; outputs sliced off below

    # Mosaic's dot lowering supports only DEFAULT / HIGHEST.  bf16 operands -> single
    # native DEFAULT pass; f32 operands keep HIGHEST so results match the f32 reference
    # to 2e-3 (extra MXU passes are hidden behind HBM traffic on this mem-bound kernel).
    precision = (lax.Precision.DEFAULT if io_dtype == jnp.dtype(jnp.bfloat16)
                 else lax.Precision.HIGHEST)

    kernel = functools.partial(_up_kernel, c_out=c_out, l_out=l_out,
                               apply_norm_act=not last, precision=precision)

    cost = pl.CostEstimate(
        flops=2 * n * (c_in * l_in) * (c_out * l_out),
        transcendentals=0 if last else n * c_out,
        bytes_accessed=int(x2d.size * io_dtype.itemsize + t_mat.size * io_dtype.itemsize
                           + bias_flat.size * 4 + n_pad * c_out * l_out * 4))

    out2d = pl.pallas_call(
        kernel,
        out_shape=jax.ShapeDtypeStruct((n_pad, c_out * l_out), jnp.float32),
        grid_spec=pltpu.PrefetchScalarGridSpec(
            num_scalar_prefetch=0,
            grid=(steps,),
            in_specs=[
                pl.BlockSpec((tb, c_in * l_in), lambda b: (b, 0)),
                pl.BlockSpec((c_in * l_in, c_out * l_out), lambda b: (0, 0)),
                pl.BlockSpec((1, c_out * l_out), lambda b: (0, 0)),
            ],
            out_specs=pl.BlockSpec((tb, c_out * l_out), lambda b: (b, 0)),
        ),
        compiler_params=pltpu.CompilerParams(
            dimension_semantics=("parallel",),
            vmem_limit_bytes=int(min(max(vmem_cap * 3 // 4, 32 * 1024 * 1024),
                                     100 * 1024 * 1024))),
        cost_estimate=cost,
    )(x2d, t_mat, bias_flat)

    if n_pad != n:
        out2d = out2d[:n]
    return out2d.reshape(n, c_out, l_out)


def _reference_forward(x, weight, bias, *, stride, padding, last):
    """Definition-level ConvTranspose1d + InstanceNorm1d + LeakyReLU in pure JAX (f32)."""
    n, c_in, l_in = x.shape
    c_out, k = weight.shape[1], weight.shape[2]
    l_full = (l_in - 1) * stride + k
    out = jnp.zeros((n, c_out, l_full), jnp.float32)
    for i in range(l_in):
        contrib = jnp.sum(x[:, :, i][:, :, None, None] * weight[None], axis=1)  # (N, C_out, K)
        out = out.at[:, :, i * stride:i * stride + k].add(contrib)
    l_out = (l_in - 1) * stride - 2 * padding + k
    out = out[:, :, padding:padding + l_out] + bias[None, :, None]
    if not last:
        mean = out.mean(axis=-1, keepdims=True)
        var = ((out - mean) ** 2).mean(axis=-1, keepdims=True)
        out = (out - mean) / jnp.sqrt(var + _EPS)
        out = jnp.where(out > 0, out, _LEAKY_SLOPE * out)
    return out


if __name__ == "__main__":
    # Shapes consistent with the module: in_channel=8, out_channel=4, kernel=4,
    # stride=2, padding=1, batch=4, L_in=16 -> L_out=32 (C_out*L_out = 128 lanes).
    N, C_IN, C_OUT, L_IN = 4, 8, 4, 16
    K, STRIDE, PADDING = 4, 2, 1

    key = jax.random.PRNGKey(0)
    kx, kw, kb = jax.random.split(key, 3)
    x = jax.random.normal(kx, (N, C_IN, L_IN), dtype=jnp.float32)
    w = 0.2 * jax.random.normal(kw, (C_IN, C_OUT, K), dtype=jnp.float32)
    b = 0.1 * jax.random.normal(kb, (C_OUT,), dtype=jnp.float32)

    L_OUT = (L_IN - 1) * STRIDE - 2 * PADDING + K

    # last=False path (dconv -> instance norm -> leaky relu), f32 I/O.
    fwd = jax.jit(functools.partial(up_forward, stride=STRIDE, padding=PADDING, last=False))
    out = jax.block_until_ready(fwd(x, w, b))
    ref = _reference_forward(x, w, b, stride=STRIDE, padding=PADDING, last=False)
    assert out.shape == (N, C_OUT, L_OUT)
    assert jnp.allclose(out, ref, atol=2e-3, rtol=2e-3), "mismatch vs JAX reference (last=False)"

    # last=True path (dconv only), f32 I/O.
    fwd_last = jax.jit(functools.partial(up_forward, stride=STRIDE, padding=PADDING, last=True))
    out_last = jax.block_until_ready(fwd_last(x, w, b))
    ref_last = _reference_forward(x, w, b, stride=STRIDE, padding=PADDING, last=True)
    assert out_last.shape == (N, C_OUT, L_OUT)
    assert jnp.allclose(out_last, ref_last, atol=2e-3, rtol=2e-3), "mismatch vs JAX reference (last=True)"

    # bf16 I/O path (single DEFAULT-precision MXU pass, half the HBM bytes); looser
    # tolerance since the matmul operands are bf16-quantized.
    fwd_bf16 = jax.jit(functools.partial(up_forward, stride=STRIDE, padding=PADDING,
                                         last=False, io_dtype=jnp.bfloat16))
    out_bf16 = jax.block_until_ready(fwd_bf16(x, w, b))
    assert out_bf16.shape == (N, C_OUT, L_OUT)
    assert jnp.allclose(out_bf16, ref, atol=3e-2, rtol=3e-2), "mismatch vs JAX reference (bf16 io)"

    print("KERNEL_OK")
</pallas_src>

<mosaic_0001>
module attributes {stable_mosaic.version = 11 : i64} {
  func.func @_up_kernel(%arg0: i32, %arg1: memref<4x128xf32, #tpu.memory_space<vmem>>, %arg2: memref<128x128xf32, #tpu.memory_space<vmem>>, %arg3: memref<1x128xf32, #tpu.memory_space<vmem>>, %arg4: memref<4x128xf32, #tpu.memory_space<vmem>>) attributes {dimension_semantics = [#tpu.dimension_semantics<parallel>], iteration_bounds = array<i64: 1>, scalar_prefetch = 0 : i64, scratch_operands = 0 : i64, tpu.core_type = #tpu.core_type<tc>, window_params = [{transform_indices = @transform_0, window_bounds = array<i64: 4, 128>}, {pipeline_mode = #tpu.pipeline_mode<synchronous>, transform_indices = @transform_1, window_bounds = array<i64: 128, 128>}, {pipeline_mode = #tpu.pipeline_mode<synchronous>, transform_indices = @transform_2, window_bounds = array<i64: 1, 128>}, {transform_indices = @transform_3, window_bounds = array<i64: 4, 128>}]} {
    %c0 = arith.constant 0 : index
    %c0_0 = arith.constant 0 : index
    %0 = vector.load %arg1[%c0, %c0_0] : memref<4x128xf32, #tpu.memory_space<vmem>>, vector<4x128xf32>
    %c0_1 = arith.constant 0 : index
    %c0_2 = arith.constant 0 : index
    %1 = vector.load %arg2[%c0_1, %c0_2] : memref<128x128xf32, #tpu.memory_space<vmem>>, vector<128x128xf32>
    %cst = arith.constant dense<0.000000e+00> : vector<4x128xf32>
    %2 = tpu.matmul %0, %1, %cst {dimension_numbers = #tpu.dot_dimension_numbers<[1], [0], [0], [1], [0, 0, 1, 1], [], []>, precision = #tpu.contract_precision<fp32>} : vector<4x128xf32>, vector<128x128xf32>, vector<4x128xf32> -> vector<4x128xf32>
    %c0_3 = arith.constant 0 : index
    %c0_4 = arith.constant 0 : index
    %3 = vector.load %arg3[%c0_3, %c0_4] : memref<1x128xf32, #tpu.memory_space<vmem>>, vector<1x128xf32>
    %4 = vector.broadcast %3 : vector<1x128xf32> to vector<4x128xf32>
    %5 = arith.addf %2, %4 : vector<4x128xf32>
    %6 = vector.shape_cast %5 : vector<4x128xf32> to vector<4x4x32xf32>
    %cst_5 = arith.constant dense<0.000000e+00> : vector<4x4xf32>
    %7 = vector.multi_reduction <add>, %6, %cst_5 [2] : vector<4x4x32xf32> to vector<4x4xf32>
    %8 = vector.shape_cast %7 : vector<4x4xf32> to vector<4x4x1xf32>
    %cst_6 = arith.constant 3.200000e+01 : f32
    %9 = vector.broadcast %cst_6 : f32 to vector<4x4x1xf32>
    %10 = arith.divf %8, %9 : vector<4x4x1xf32>
    %11 = vector.broadcast %10 : vector<4x4x1xf32> to vector<4x4x32xf32>
    %12 = arith.subf %6, %11 : vector<4x4x32xf32>
    %13 = arith.mulf %12, %12 : vector<4x4x32xf32>
    %cst_7 = arith.constant dense<0.000000e+00> : vector<4x4xf32>
    %14 = vector.multi_reduction <add>, %13, %cst_7 [2] : vector<4x4x32xf32> to vector<4x4xf32>
    %15 = vector.shape_cast %14 : vector<4x4xf32> to vector<4x4x1xf32>
    %cst_8 = arith.constant 3.200000e+01 : f32
    %16 = vector.broadcast %cst_8 : f32 to vector<4x4x1xf32>
    %17 = arith.divf %15, %16 : vector<4x4x1xf32>
    %cst_9 = arith.constant 9.99999974E-6 : f32
    %18 = vector.broadcast %cst_9 : f32 to vector<4x4x1xf32>
    %19 = arith.addf %17, %18 : vector<4x4x1xf32>
    %20 = math.rsqrt %19 : vector<4x4x1xf32>
    %21 = vector.broadcast %20 : vector<4x4x1xf32> to vector<4x4x32xf32>
    %22 = arith.mulf %12, %21 : vector<4x4x32xf32>
    %cst_10 = arith.constant 0.000000e+00 : f32
    %23 = vector.broadcast %cst_10 : f32 to vector<4x4x32xf32>
    %24 = arith.cmpf ogt, %22, %23 : vector<4x4x32xf32>
    %cst_11 = arith.constant 0.00999999977 : f32
    %25 = vector.broadcast %cst_11 : f32 to vector<4x4x32xf32>
    %26 = arith.mulf %25, %22 : vector<4x4x32xf32>
    %27 = arith.select %24, %22, %26 : vector<4x4x32xi1>, vector<4x4x32xf32>
    %28 = vector.shape_cast %27 : vector<4x4x32xf32> to vector<4x128xf32>
    %c0_12 = arith.constant 0 : index
    %c0_13 = arith.constant 0 : index
    %29 = vector.load %arg4[%c0_12, %c0_13] : memref<4x128xf32, #tpu.memory_space<vmem>>, vector<4x128xf32>
    tpu.vector_store %arg4[%c0_12, %c0_13], %28 {strides = array<i32>} : memref<4x128xf32, #tpu.memory_space<vmem>>, vector<4x128xf32>,
    return
  }
  func.func @transform_0(%arg0: i32) -> (i32, i32) {
    %c0_i32 = arith.constant 0 : i32
    %c0_i32_0 = arith.constant 0 : i32
    return %arg0, %c0_i32 : i32, i32
  }
  func.func @transform_1(%arg0: i32) -> (i32, i32) {
    %c0_i32 = arith.constant 0 : i32
    %c0_i32_0 = arith.constant 0 : i32
    %c0_i32_1 = arith.constant 0 : i32
    return %c0_i32, %c0_i32_0 : i32, i32
  }
  func.func @transform_2(%arg0: i32) -> (i32, i32) {
    %c0_i32 = arith.constant 0 : i32
    %c0_i32_0 = arith.constant 0 : i32
    %c0_i32_1 = arith.constant 0 : i32
    return %c0_i32, %c0_i32_0 : i32, i32
  }
  func.func @transform_3(%arg0: i32) -> (i32, i32) {
    %c0_i32 = arith.constant 0 : i32
    %c0_i32_0 = arith.constant 0 : i32
    return %arg0, %c0_i32 : i32, i32
  }
}

</mosaic_0001>

<bundles_post_ra>
// kernel: up_forward.1
= control target key start
LH: loop header
LB: loop body
LE: loop exit
PB: predicated region body
PF: predicated region fallthrough
CT: control target
= control target key end

     0   :  { %v1174_v0 = vmov 0.0   ;;  %vm1175_vm0 = vmmov 0   ;;  %s1176_s19 = smov 32   ;;  %s1177_s20 = smov 96   ;;  %vm723_vm1 = vcmask 257024   ;;  %vm835_vm6 = vcmask 261120   ;;  %s1651_s1 = inlined_call_operand.vmem [shape: f32[128,128], index: 1, kind: input, shape index: {}]   ;;  %s1652_s0 = inlined_call_operand.vmem [shape: f32[4,128], index: 0, kind: input, shape index: {}]   ;;  %s1653_s2 = inlined_call_operand.vmem [shape: f32[1,128], index: 2, kind: input, shape index: {}]   ;;  %s1654_s3 = inlined_call_operand.vmem [shape: f32[4,128], index: 3, kind: output, shape index: {}]  }
   0x1   :  { %949 = vmatprep.subr.mxu0 %v1174_v0  ;;  %v30_v1 = vld [vmem:[%s1651_s1 + $0x78] sm:$0xff]  ;;  %v29_v2 = vld [vmem:[%s1651_s1 + $0x70] sm:$0xff]  ;;  %v28_v3 = vld [vmem:[%s1651_s1 + $0x68] sm:$0xff]  ;;  %984 = vmatprep.subr.mxu1 %v1174_v0  ;;  %s1178_s21 = smov 64   ;;  %vm837_vm7 = vcmask 523264   ;;  %vm839_vm8 = vcmask 785408  }
   0x2   :  { %v1212_v4 = vand.u32 4294901760, %v30_v1  ;;  %v1214_v5 = vand.u32 4294901760, %v29_v2  ;;  %v1216_v6 = vand.u32 4294901760, %v28_v3  ;;  %v27_v7 = vld [vmem:[%s1651_s1 + $0x60] sm:$0xff]  ;;  %v26_v8 = vld [vmem:[%s1651_s1 + $0x58] sm:$0xff]  ;;  %v25_v9 = vld [vmem:[%s1651_s1 + $0x50] sm:$0xff]  ;;  %981 = vmatprep.mubr.msk.f32.mxu0 %vm1175_vm0, %v1174_v0  ;;  %1016 = vmatprep.mubr.msk.f32.mxu1 %vm1175_vm0, %v1174_v0 }
   0x3   :  { %v1231_v10 = vand.u32 4294901760, %v27_v7  ;;  %v1233_v11 = vand.u32 4294901760, %v26_v8  ;;  %v1235_v12 = vand.u32 4294901760, %v25_v9  ;;  %v24_v13 = vld [vmem:[%s1651_s1 + $0x48] sm:$0xff]  ;;  %v23_v14 = vld [vmem:[%s1651_s1 + $0x40] sm:$0xff]  ;;  %v22_v19 = vld [vmem:[%s1651_s1 + $0x38] sm:$0xff] }
   0x4   :  { %950 = vmatpush3.msra.mxu0 %v1212_v4  ;;  %v1245_v15 = vsub.f32 %v30_v1, %v1212_v4  ;;  %v1248_v16 = vsub.f32 %v29_v2, %v1214_v5  ;;  %v1250_v17 = vand.u32 4294901760, %v24_v13  ;;  %v1253_v18 = vsub.f32 %v28_v3, %v1216_v6  ;;  %v21_v26 = vld [vmem:[%s1651_s1 + $0x30] sm:$0xff]  ;;  %v20_v36 = vld [vmem:[%s1651_s1 + $0x28] sm:$0xff]  ;;  %v19_v41 = vld [vmem:[%s1651_s1 + $0x20] sm:$0xff] }
   0x5   :  { %951 = vmatprep.subr.mxu0 %v1174_v0  ;;  %v1260_v20 = vsub.f32 %v27_v7, %v1231_v10  ;;  %v1263_v21 = vsub.f32 %v26_v8, %v1233_v11  ;;  %v1269_v25 = vand.u32 4294901760, %v23_v14  ;;  %v1276_v28 = vand.u32 4294901760, %v22_v19  ;;  %v18_v49 = vld [vmem:[%s1651_s1 + $0x18] sm:$0xff]  ;;  %v14_v50 = vld [vmem:[%s1652_s0] sm:$0xf]  ;;  %v17_v54 = vld [vmem:[%s1651_s1 + $0x10] sm:$0xff] }
   0x6   :  { %952 = vmatpush3.msra.mxu0 %v1214_v5  ;;  %v132_v22 = vand.u32 4294901760, %v1245_v15  ;;  %v139_v23 = vand.u32 4294901760, %v1248_v16  ;;  %v146_v24 = vand.u32 4294901760, %v1253_v18  ;;  %v1280_v30 = vsub.f32 %v25_v9, %v1235_v12  ;;  %v16_v60 = vld [vmem:[%s1651_s1 + $0x8] sm:$0xff]  ;;  %v15_v7 = vld [vmem:[%s1651_s1] sm:$0xff] }
   0x7   :  { %953 = vmatprep.subr.mxu0 %v1174_v0  ;;  %v153_v27 = vand.u32 4294901760, %v1260_v20  ;;  %v160_v29 = vand.u32 4294901760, %v1263_v21  ;;  %v1293_v34 = vsub.f32 %v24_v13, %v1250_v17  ;;  %v1296_v35 = vand.u32 4294901760, %v21_v26 }
   0x8   :  { %954 = vmatpush3.msra.mxu0 %v1216_v6  ;;  %v133_v31 = vsub.f32 %v1245_v15, %v132_v22  ;;  %v140_v32 = vsub.f32 %v1248_v16, %v139_v23  ;;  %v147_v33 = vsub.f32 %v1253_v18, %v146_v24  ;;  %v167_v40 = vand.u32 4294901760, %v1280_v30 }
   0x9   :  { %955 = vmatprep.subr.mxu0 %v1174_v0  ;;  %v154_v39 = vsub.f32 %v1260_v20, %v153_v27  ;;  %v161_v42 = vsub.f32 %v1263_v21, %v160_v29  ;;  %v1314_v43 = vsub.f32 %v23_v14, %v1269_v25  ;;  %v1317_v45 = vand.u32 4294901760, %v20_v36 }
   0xa   :  { %956 = vmatpush3.msra.mxu0 %v1231_v10  ;;  %v134_v37 = vand.u32 4294901760, %v133_v31  ;;  %v141_v38 = vand.u32 4294901760, %v140_v32  ;;  %v148_v44 = vand.u32 4294901760, %v147_v33  ;;  %v174_v46 = vand.u32 4294901760, %v1293_v34 }
   0xb   :  { %957 = vmatprep.subr.mxu0 %v1174_v0  ;;  %v1321_v47 = vsub.f32 %v22_v19, %v1276_v28  ;;  %v1325_v48 = vand.u32 4294901760, %v19_v41  ;;  %v155_v51 = vand.u32 4294901760, %v154_v39  ;;  %v168_v52 = vsub.f32 %v1280_v30, %v167_v40 }
   0xc   :  { %958 = vmatpush3.msra.mxu0 %v1233_v11  ;;  %985 = vmatpush3.msra.mxu1 %v134_v37  ;;  %v181_v53 = vand.u32 4294901760, %v1314_v43  ;;  %v1342_v55 = vsub.f32 %v21_v26, %v1296_v35  ;;  %v162_v56 = vand.u32 4294901760, %v161_v42  ;;  %v175_v58 = vsub.f32 %v1293_v34, %v174_v46 }
   0xd   :  { %959 = vmatprep.subr.mxu0 %v1174_v0  ;;  %986 = vmatprep.subr.mxu1 %v1174_v0  ;;  %v188_v57 = vand.u32 4294901760, %v1321_v47  ;;  %v1351_v59 = vand.u32 4294901760, %v18_v49  ;;  %v1357_v61 = vsub.f32 %v20_v36, %v1317_v45  ;;  %v1359_v62 = vand.u32 4294901760, %v14_v50 }
   0xe   :  { %960 = vmatpush3.msra.mxu0 %v1235_v12  ;;  %987 = vmatpush3.msra.mxu1 %v141_v38  ;;  %v1363_v63 = vand.u32 4294901760, %v17_v54  ;;  %v169_v1 = vand.u32 4294901760, %v168_v52  ;;  %v182_v2 = vsub.f32 %v1314_v43, %v181_v53  ;;  %v195_v3 = vand.u32 4294901760, %v1342_v55 }
   0xf   :  { %961 = vmatprep.subr.mxu0 %v1174_v0  ;;  %988 = vmatprep.subr.mxu1 %v1174_v0  ;;  %v1374_v8 = vsub.f32 %v19_v41, %v1325_v48  ;;  %v189_v9 = vsub.f32 %v1321_v47, %v188_v57  ;;  %v1381_v13 = vand.u32 4294901760, %v16_v60  ;;  %v176_v14 = vand.u32 4294901760, %v175_v58 }
  0x10   :  { %962 = vmatpush3.msra.mxu0 %v1250_v17  ;;  %989 = vmatpush3.msra.mxu1 %v148_v44  ;;  %v202_v19 = vand.u32 4294901760, %v1357_v61  ;;  %v1386_v26 = vsub.f32 %v14_v50, %v1359_v62  ;;  %v1389_v31 = vsub.f32 %v18_v49, %v1351_v59  ;;  %v1393_v32 = vand.u32 4294901760, %v15_v7 }
  0x11   :  { %963 = vmatprep.subr.mxu0 %v1174_v0  ;;  %990 = vmatprep.subr.mxu1 %v1174_v0  ;;  %v183_v33 = vand.u32 4294901760, %v182_v2  ;;  %v196_v36 = vsub.f32 %v1342_v55, %v195_v3  ;;  %v209_v37 = vand.u32 4294901760, %v1374_v8  ;;  %v1401_v38 = vsub.f32 %v17_v54, %v1363_v63 }
  0x12   :  { %964 = vmatpush3.msra.mxu0 %v1269_v25  ;;  %991 = vmatpush3.msra.mxu1 %v155_v51  ;;  %v190_v39 = vand.u32 4294901760, %v189_v9  ;;  %v203_v41 = vsub.f32 %v1357_v61, %v202_v19  ;;  %v121_v42 = vand.u32 4294901760, %v1386_v26  ;;  %v216_v44 = vand.u32 4294901760, %v1389_v31 }
  0x13   :  { %965 = vmatprep.subr.mxu0 %v1174_v0  ;;  %992 = vmatprep.subr.mxu1 %v1174_v0  ;;  %v1412_v49 = vsub.f32 %v16_v60, %v1381_v13  ;;  %v197_v50 = vand.u32 4294901760, %v196_v36  ;;  %v210_v51 = vsub.f32 %v1374_v8, %v209_v37  ;;  %v223_v52 = vand.u32 4294901760, %v1401_v38 }
  0x14   :  { %966 = vmatpush3.msra.mxu0 %v1276_v28  ;;  %993 = vmatpush3.msra.mxu1 %v162_v56  ;;  %v1422_v54 = vsub.f32 %v15_v7, %v1393_v32  ;;  %v204_v56 = vand.u32 4294901760, %v203_v41  ;;  %v122_v58 = vsub.f32 %v1386_v26, %v121_v42  ;;  %v217_v60 = vsub.f32 %v1389_v31, %v216_v44 }
  0x15   :  { %967 = vmatprep.subr.mxu0 %v1174_v0  ;;  %994 = vmatprep.subr.mxu1 %v1174_v0  ;;  %v211_v2 = vand.u32 4294901760, %v210_v51  ;;  %v224_v7 = vsub.f32 %v1401_v38, %v223_v52 }
  0x16   :  { %968 = vmatpush3.msra.mxu0 %v1296_v35  ;;  %995 = vmatpush3.msra.mxu1 %v169_v1  ;;  %v230_v1 = vand.u32 4294901760, %v1412_v49  ;;  %v237_v9 = vand.u32 4294901760, %v1422_v54 }
  0x17   :  { %969 = vmatprep.subr.mxu0 %v1174_v0  ;;  %996 = vmatprep.subr.mxu1 %v1174_v0 }
  0x18   :  { %970 = vmatpush3.msra.mxu0 %v1317_v45  ;;  %997 = vmatpush3.msra.mxu1 %v176_v14  ;;  %v123_v14 = vand.u32 4294901760, %v122_v58  ;;  %v231_v36 = vsub.f32 %v1412_v49, %v230_v1  ;;  %v238_v41 = vsub.f32 %v1422_v54, %v237_v9 }
  0x19   :  { %971 = vmatprep.subr.mxu0 %v1174_v0  ;;  %998 = vmatprep.subr.mxu1 %v1174_v0 }
  0x1a   :  { %972 = vmatpush3.msra.mxu0 %v1325_v48  ;;  %999 = vmatpush3.msra.mxu1 %v183_v33  ;;  %v218_v33 = vand.u32 4294901760, %v217_v60  ;;  %v239_v51 = vand.u32 4294901760, %v238_v41 }
  0x1b   :  { %973 = vmatprep.subr.mxu0 %v1174_v0  ;;  %1000 = vmatprep.subr.mxu1 %v1174_v0 }
  0x1c   :  { %974 = vmatpush3.msra.mxu0 %v1351_v59  ;;  %1001 = vmatpush3.msra.mxu1 %v190_v39  ;;  %v225_v39 = vand.u32 4294901760, %v224_v7 }
  0x1d   :  { %975 = vmatprep.subr.mxu0 %v1174_v0  ;;  %1002 = vmatprep.subr.mxu1 %v1174_v0 }
  0x1e   :  { %976 = vmatpush3.msra.mxu0 %v1363_v63  ;;  %1003 = vmatpush3.msra.mxu1 %v197_v50  ;;  %v232_v50 = vand.u32 4294901760, %v231_v36 }
  0x1f   :  { %977 = vmatprep.subr.mxu0 %v1174_v0  ;;  %1004 = vmatprep.subr.mxu1 %v1174_v0 }
  0x20   :  { %978 = vmatpush3.msra.mxu0 %v1381_v13  ;;  %1005 = vmatpush3.msra.mxu1 %v204_v56 }
  0x21   :  { %979 = vmatprep.subr.mxu0 %v1174_v0  ;;  %1006 = vmatprep.subr.mxu1 %v1174_v0 }
  0x22   :  { %980 = vmatpush3.msra.mxu0 %v1393_v32  ;;  %1007 = vmatpush3.msra.mxu1 %v211_v2 }
  0x23   :  { %1008 = vmatprep.subr.mxu1 %v1174_v0  ;;  %1019 = vmatprep.subr.mxu0 %v1174_v0 }
  0x24   :  { %982 = vmatmul.mubr.f32.vlgmr.msra.gmra.mxu0 %v123_v14  ;;  %1009 = vmatpush3.msra.mxu1 %v218_v33 }
  0x25   :  { %1020 = vmatpush3.msra.mxu0 %v1245_v15  ;;  %1010 = vmatprep.subr.mxu1 %v1174_v0 }
  0x26   :  { %1021 = vmatprep.subr.mxu0 %v1174_v0  ;;  %1011 = vmatpush3.msra.mxu1 %v225_v39 }
  0x27   :  { %1022 = vmatpush3.msra.mxu0 %v1248_v16  ;;  %1012 = vmatprep.subr.mxu1 %v1174_v0 }
  0x28   :  { %1023 = vmatprep.subr.mxu0 %v1174_v0  ;;  %1013 = vmatpush3.msra.mxu1 %v232_v50 }
  0x29   :  { %1024 = vmatpush3.msra.mxu0 %v1253_v18  ;;  %1014 = vmatprep.subr.mxu1 %v1174_v0 }
  0x2a   :  { %1025 = vmatprep.subr.mxu0 %v1174_v0  ;;  %1015 = vmatpush3.msra.mxu1 %v239_v51 }
  0x2b   :  { %1026 = vmatpush3.msra.mxu0 %v1260_v20  ;;  %1017 = vmatmul.mubr.f32.vlgmr.msra.gmra.mxu1 %v1359_v62 }
  0x2c   :  { %1027 = vmatprep.subr.mxu0 %v1174_v0  ;;  %1054 = vmatprep.subr.mxu1 %v1174_v0 }
  0x2d   :  { %1028 = vmatpush3.msra.mxu0 %v1263_v21  ;;  %1055 = vmatpush3.msra.mxu1 %v1212_v4 }
  0x2e   :  { %1029 = vmatprep.subr.mxu0 %v1174_v0  ;;  %1056 = vmatprep.subr.mxu1 %v1174_v0 }
  0x2f   :  { %1030 = vmatpush3.msra.mxu0 %v1280_v30  ;;  %1057 = vmatpush3.msra.mxu1 %v1214_v5  ;;  %v1179_v30 = vmov 1983009808  }
  0x30   :  { %1031 = vmatprep.subr.mxu0 %v1174_v0  ;;  %1058 = vmatprep.subr.mxu1 %v1174_v0 }
  0x31   :  { %1032 = vmatpush3.msra.mxu0 %v1293_v34  ;;  %1059 = vmatpush3.msra.mxu1 %v1216_v6  ;;  %v691_v34 = vunpack.c.l.s4 %v1179_v30 }
  0x32   :  { %1033 = vmatprep.subr.mxu0 %v1174_v0  ;;  %1060 = vmatprep.subr.mxu1 %v1174_v0 }
  0x33   :  { %1034 = vmatpush3.msra.mxu0 %v1314_v43  ;;  %1061 = vmatpush3.msra.mxu1 %v1231_v10 }
  0x34   :  { %1035 = vmatprep.subr.mxu0 %v1174_v0  ;;  %1062 = vmatprep.subr.mxu1 %v1174_v0 }
  0x35   :  { %1036 = vmatpush3.msra.mxu0 %v1321_v47  ;;  %1063 = vmatpush3.msra.mxu1 %v1233_v11 }
  0x36   :  { %1037 = vmatprep.subr.mxu0 %v1174_v0  ;;  %1064 = vmatprep.subr.mxu1 %v1174_v0 }
  0x37   :  { %1038 = vmatpush3.msra.mxu0 %v1342_v55  ;;  %1065 = vmatpush3.msra.mxu1 %v1235_v12 }
  0x38   :  { %1039 = vmatprep.subr.mxu0 %v1174_v0  ;;  %1066 = vmatprep.subr.mxu1 %v1174_v0 }
  0x39   :  { %1040 = vmatpush3.msra.mxu0 %v1357_v61  ;;  %1067 = vmatpush3.msra.mxu1 %v1250_v17 }
  0x3a   :  { %1041 = vmatprep.subr.mxu0 %v1174_v0  ;;  %1068 = vmatprep.subr.mxu1 %v1174_v0 }
  0x3b   :  { %1042 = vmatpush3.msra.mxu0 %v1374_v8  ;;  %1069 = vmatpush3.msra.mxu1 %v1269_v25 }
  0x3c   :  { %1043 = vmatprep.subr.mxu0 %v1174_v0  ;;  %1070 = vmatprep.subr.mxu1 %v1174_v0 }
  0x3d   :  { %1044 = vmatpush3.msra.mxu0 %v1389_v31  ;;  %1071 = vmatpush3.msra.mxu1 %v1276_v28 }
  0x3e   :  { %1045 = vmatprep.subr.mxu0 %v1174_v0  ;;  %1072 = vmatprep.subr.mxu1 %v1174_v0 }
  0x3f   :  { %1046 = vmatpush3.msra.mxu0 %v1401_v38  ;;  %1073 = vmatpush3.msra.mxu1 %v1296_v35 }
  0x40   :  { %1047 = vmatprep.subr.mxu0 %v1174_v0  ;;  %1074 = vmatprep.subr.mxu1 %v1174_v0 }
  0x41   :  { %1048 = vmatpush3.msra.mxu0 %v1412_v49  ;;  %1075 = vmatpush3.msra.mxu1 %v1317_v45 }
  0x42   :  { %1049 = vmatprep.subr.mxu0 %v1174_v0  ;;  %1076 = vmatprep.subr.mxu1 %v1174_v0 }
  0x43   :  { %1050 = vmatpush3.msra.mxu0 %v1422_v54  ;;  %1051 = vmatprep.mubr.msk.f32.mxu0 %vm1175_vm0, %v1174_v0 }
  0x44   :  { %1077 = vmatpush3.msra.mxu1 %v1325_v48  ;;  %1052 = vmatmul.mubr.f32.vlgmr.msra.gmra.mxu0 %v1386_v26 }
  0x45   :  { %1078 = vmatprep.subr.mxu1 %v1174_v0  ;;  %1089 = vmatprep.subr.mxu0 %v1174_v0 }
  0x46   :  { %1079 = vmatpush3.msra.mxu1 %v1351_v59  ;;  %1090 = vmatpush3.msra.mxu0 %v132_v22 }
  0x47   :  { %1080 = vmatprep.subr.mxu1 %v1174_v0  ;;  %1091 = vmatprep.subr.mxu0 %v1174_v0 }
  0x48   :  { %1081 = vmatpush3.msra.mxu1 %v1363_v63  ;;  %1092 = vmatpush3.msra.mxu0 %v139_v23 }
  0x49   :  { %1082 = vmatprep.subr.mxu1 %v1174_v0  ;;  %1093 = vmatprep.subr.mxu0 %v1174_v0 }
  0x4a   :  { %1083 = vmatpush3.msra.mxu1 %v1381_v13  ;;  %1094 = vmatpush3.msra.mxu0 %v146_v24 }
  0x4b   :  { %1084 = vmatprep.subr.mxu1 %v1174_v0  ;;  %1095 = vmatprep.subr.mxu0 %v1174_v0 }
  0x4c   :  { %1085 = vmatpush3.msra.mxu1 %v1393_v32  ;;  %1086 = vmatprep.mubr.msk.f32.mxu1 %vm1175_vm0, %v1174_v0 }
  0x4d   :  { %1096 = vmatpush3.msra.mxu0 %v153_v27  ;;  %1087 = vmatmul.mubr.f32.vlgmr.msra.gmra.mxu1 %v121_v42 }
  0x4e   :  { %1097 = vmatprep.subr.mxu0 %v1174_v0  ;;  %1124 = vmatprep.subr.mxu1 %v1174_v0 }
  0x4f   :  { %1098 = vmatpush3.msra.mxu0 %v160_v29  ;;  %1125 = vmatpush3.msra.mxu1 %v1212_v4 }
  0x50   :  { %1099 = vmatprep.subr.mxu0 %v1174_v0  ;;  %1126 = vmatprep.subr.mxu1 %v1174_v0 }
  0x51   :  { %1100 = vmatpush3.msra.mxu0 %v167_v40  ;;  %1127 = vmatpush3.msra.mxu1 %v1214_v5  ;;  %v692_v40 = vunpack.c.0.s8 %v691_v34 }
  0x52   :  { %1101 = vmatprep.subr.mxu0 %v1174_v0  ;;  %1128 = vmatprep.subr.mxu1 %v1174_v0 }
  0x53   :  { %1102 = vmatpush3.msra.mxu0 %v174_v46  ;;  %1129 = vmatpush3.msra.mxu1 %v1216_v6 }
  0x54   :  { %1103 = vmatprep.subr.mxu0 %v1174_v0  ;;  %1130 = vmatprep.subr.mxu1 %v1174_v0 }
  0x55   :  { %1104 = vmatpush3.msra.mxu0 %v181_v53  ;;  %1131 = vmatpush3.msra.mxu1 %v1231_v10 }
  0x56   :  { %1105 = vmatprep.subr.mxu0 %v1174_v0  ;;  %1132 = vmatprep.subr.mxu1 %v1174_v0 }
  0x57   :  { %1106 = vmatpush3.msra.mxu0 %v188_v57  ;;  %1133 = vmatpush3.msra.mxu1 %v1233_v11 }
  0x58   :  { %1107 = vmatprep.subr.mxu0 %v1174_v0  ;;  %1134 = vmatprep.subr.mxu1 %v1174_v0 }
  0x59   :  { %1108 = vmatpush3.msra.mxu0 %v195_v3  ;;  %1135 = vmatpush3.msra.mxu1 %v1235_v12 }
  0x5a   :  { %1109 = vmatprep.subr.mxu0 %v1174_v0  ;;  %1136 = vmatprep.subr.mxu1 %v1174_v0 }
  0x5b   :  { %1110 = vmatpush3.msra.mxu0 %v202_v19  ;;  %1137 = vmatpush3.msra.mxu1 %v1250_v17  ;;  %v846_v17 = vld [vmem:[%s1653_s2] ss:$0 sm:$0xff] }
  0x5c   :  { %1111 = vmatprep.subr.mxu0 %v1174_v0  ;;  %1138 = vmatprep.subr.mxu1 %v1174_v0 }
  0x5d   :  { %1112 = vmatpush3.msra.mxu0 %v209_v37  ;;  %1139 = vmatpush3.msra.mxu1 %v1269_v25 }
  0x5e   :  { %1113 = vmatprep.subr.mxu0 %v1174_v0  ;;  %1140 = vmatprep.subr.mxu1 %v1174_v0 }
  0x5f   :  { %1114 = vmatpush3.msra.mxu0 %v216_v44  ;;  %1141 = vmatpush3.msra.mxu1 %v1276_v28 }
  0x60   :  { %1115 = vmatprep.subr.mxu0 %v1174_v0  ;;  %1142 = vmatprep.subr.mxu1 %v1174_v0 }
  0x61   :  { %1116 = vmatpush3.msra.mxu0 %v223_v52  ;;  %1143 = vmatpush3.msra.mxu1 %v1296_v35  ;;  %v693_v35 = vlaneseq }
  0x62   :  { %1117 = vmatprep.subr.mxu0 %v1174_v0  ;;  %1144 = vmatprep.subr.mxu1 %v1174_v0 }
  0x63   :  { %1118 = vmatpush3.msra.mxu0 %v230_v1  ;;  %1145 = vmatpush3.msra.mxu1 %v1317_v45  ;;  %v694_v43 = vshrl.u32 %v693_v35, 7  ;;  %v1180_v45 = vmov 1934713408  }
  0x64   :  { %1119 = vmatprep.subr.mxu0 %v1174_v0  ;;  %1146 = vmatprep.subr.mxu1 %v1174_v0  ;;  %v708_v46 = vunpack.c.l.s4 %v1180_v45 }
  0x65   :  { %1120 = vmatpush3.msra.mxu0 %v237_v9  ;;  %1121 = vmatprep.mubr.msk.f32.mxu0 %vm1175_vm0, %v1174_v0  ;;  %v1621_v53 = vsub.s32 %v692_v40, %v694_v43 }
  0x66   :  { %1147 = vmatpush3.msra.mxu1 %v1325_v48  ;;  %1122 = vmatmul.mubr.f32.vlgmr.msra.gmra.mxu0 %v1359_v62  ;;  %v709_v57 = vunpack.c.0.s8 %v708_v46 }
  0x67   :  { %1148 = vmatprep.subr.mxu1 %v1174_v0  ;;  %1156 = vmatprep.mubr.msk.f32.mxu1 %vm1175_vm0, %v1174_v0 }
  0x68   :  { %1149 = vmatpush3.msra.mxu1 %v1351_v59 }
  0x69   :  { %1150 = vmatprep.subr.mxu1 %v1174_v0 }
  0x6a   :  { %1151 = vmatpush3.msra.mxu1 %v1363_v63  ;;  %v1624_v63 = vsub.s32 %v709_v57, %v694_v43 }
  0x6b   :  { %1152 = vmatprep.subr.mxu1 %v1174_v0 }
  0x6c   :  { %1153 = vmatpush3.msra.mxu1 %v1381_v13 }
  0x6d   :  { %1154 = vmatprep.subr.mxu1 %v1174_v0 }
  0x6e   :  { %1155 = vmatpush3.msra.mxu1 %v1393_v32 }
  0x6f   :  { %1157 = vmatmul.mubr.f32.vlgmr.msra.gmra.mxu1 %v1359_v62 }
  0xe4   :  { %v125_v4 = vpop.f32.mrf.mxu0 }
  0xe5   :  { %v126_v18 = vadd.f32 %v846_v17, %v125_v4 }
  0xe6   :  { %v983_v5 = vpop.f32.mrf.mxu0 }
  0xeb   :  { %v276_v6 = vpop.f32.mrf.mxu1 }
  0xec   :  { %v277_v21 = vadd.f32 %v276_v6, %v126_v18 }
  0xed   :  { %v1018_v10 = vpop.f32.mrf.mxu1 }
 0x104   :  { %v380_v11 = vpop.f32.mrf.mxu0 }
 0x105   :  { %v381_v23 = vadd.f32 %v380_v11, %v277_v21 }
 0x106   :  { %v1053_v12 = vpop.f32.mrf.mxu0 }
 0x10d   :  { %v469_v15 = vpop.f32.mrf.mxu1 }
 0x10e   :  { %v470_v24 = vadd.f32 %v469_v15, %v381_v23 }
 0x10f   :  { %v1088_v16 = vpop.f32.mrf.mxu1 }
 0x126   :  { %v588_v20 = vpop.f32.mrf.mxu0 }
 0x127   :  { %v589_v25 = vadd.f32 %v588_v20, %v470_v24 }
 0x128   :  { %v1123_v22 = vpop.f32.mrf.mxu0 }
 0x12f   :  { %v675_v27 = vpop.f32.mrf.mxu1 }
 0x130   :  { %v676_v28 = vadd.f32 %v675_v27, %v589_v25 }
 0x131   :  { %v1158_v29 = vpop.f32.mrf.mxu1 }
 0x132   :  { %686 = vrot.lane.b32.xlu1 %v676_v28, %s1176_s19  ;;  %680 = vrot.lane.b32.xlu0 %v676_v28, %s1177_s20 }
 0x136   :  { %683 = vrot.lane.b32.xlu0 %v676_v28, %s1178_s21 }
 0x1a4   :  { %v687_v47 = vpop.permute.xlu1 %686  ;;  %v681_v48 = vpop.permute.xlu0 %680 }
 0x1a5   :  { %v697_v55 = vcombine.low %v681_v48, %v687_v47 }
 0x1a7   :  { %v704_v62 = vrot.slane %v697_v55, %v1621_v53 }
 0x1a8   :  { %v684_v59 = vpop.permute.xlu0 %683 }
 0x1a9   :  { %v689_v61 = vcombine.low %v676_v28, %v684_v59 }
 0x1ab   :  { %v696_v3 = vrot.slane %v689_v61, %v1621_v53 }
 0x1ad   :  { %v705_v8 = vcombine.low %v696_v3, %v704_v62  ;;  %v706_v13 = vcombine.high %v696_v3, %v704_v62 }
 0x1af   :  { %v720_v19 = vrot.slane %v706_v13, %v1624_v63  ;;  %v713_v26 = vrot.slane %v705_v8, %v1624_v63 }
 0x1b1   :  { %v724_v31 = vsel %vm723_vm1, %v713_v26, 0.0  ;;  %v721_v32 = vcombine.high %v713_v26, %v1174_v0  ;;  %v722_v37 = vcombine.high %v720_v19, %v1174_v0  ;;  %v730_v44 = vsel %vm723_vm1, %v720_v19, 0.0 }
 0x1b2   :  { %725 = vadd.xlane.f32.xlu1 %v724_v31 }
 0x1b3   :  { %v727_v38 = vsel %vm723_vm1, %v721_v32, 0.0  ;;  %v733_v42 = vsel %vm723_vm1, %v722_v37, 0.0 }
 0x1b4   :  { %728 = vadd.xlane.f32.xlu0 %v727_v38 }
 0x1b6   :  { %734 = vadd.xlane.f32.xlu1 %v733_v42 }
 0x1b8   :  { %731 = vadd.xlane.f32.xlu0 %v730_v44 }
 0x23b   :  { %v726_v49 = vpop.xlane.xlu1 %725 }
 0x23c   :  { %v737_v52 = vmul.f32 0.03125, %v726_v49 }
 0x23d   :  { %v729_v54 = vpop.xlane.xlu0 %728 }
 0x23e   :  { %v741_v56 = vsub.f32 %v713_v26, %v737_v52  ;;  %v738_v58 = vmul.f32 0.03125, %v729_v54 }
 0x23f   :  { %v735_v60 = vpop.xlane.xlu1 %734 }
 0x240   :  { %v742_v1 = vsub.f32 %v721_v32, %v738_v58  ;;  %v740_v2 = vmul.f32 0.03125, %v735_v60  ;;  %v745_v7 = vmul.f32 %v741_v56, %v741_v56 }
 0x241   :  { %v732_v9 = vpop.xlane.xlu0 %731 }
 0x242   :  { %v744_v14 = vsub.f32 %v722_v37, %v740_v2  ;;  %v739_v33 = vmul.f32 0.03125, %v732_v9  ;;  %v749_v36 = vsel %vm723_vm1, %v745_v7, 0.0  ;;  %v746_v39 = vmul.f32 %v742_v1, %v742_v1 }
 0x243   :  { %750 = vadd.xlane.f32.xlu0 %v749_v36 }
 0x244   :  { %v743_v41 = vsub.f32 %v720_v19, %v739_v33  ;;  %v752_v50 = vsel %vm723_vm1, %v746_v39, 0.0  ;;  %v748_v51 = vmul.f32 %v744_v14, %v744_v14 }
 0x245   :  { %753 = vadd.xlane.f32.xlu1 %v752_v50 }
 0x246   :  { %v747_v4 = vmul.f32 %v743_v41, %v743_v41  ;;  %v758_v5 = vsel %vm723_vm1, %v748_v51, 0.0 }
 0x248   :  { %v755_v6 = vsel %vm723_vm1, %v747_v4, 0.0 }
 0x249   :  { %759 = vadd.xlane.f32.xlu1 %v758_v5  ;;  %756 = vadd.xlane.f32.xlu0 %v755_v6 }
 0x2cc   :  { %v751_v10 = vpop.xlane.xlu0 %750 }
 0x2cd   :  { %v761_v11 = vmul.f32 0.03125, %v751_v10 }
 0x2ce   :  { %v754_v12 = vpop.xlane.xlu1 %753 }
 0x2cf   :  { %v765_v15 = vadd.f32 1e-05, %v761_v11  ;;  %v762_v16 = vmul.f32 0.03125, %v754_v12 }
 0x2d1   :  { %v766_v17 = vadd.f32 1e-05, %v762_v16  ;;  %1166 = vrsqrt.f32 %v765_v15 }
 0x2d2   :  { %v760_v18 = vpop.xlane.xlu1 %759  ;;  %v757_v20 = vpop.xlane.xlu0 %756 }
 0x2d3   :  { %1168 = vrsqrt.f32 %v766_v17  ;;  %v764_v21 = vmul.f32 0.03125, %v760_v18  ;;  %v763_v22 = vmul.f32 0.03125, %v757_v20 }
 0x2d5   :  { %v768_v23 = vadd.f32 1e-05, %v764_v21  ;;  %v767_v24 = vadd.f32 1e-05, %v763_v22 }
 0x2d7   :  { %1170 = vrsqrt.f32 %v768_v23 }
 0x2d8   :  { %1172 = vrsqrt.f32 %v767_v24 }
 0x2de   :  { %v1167_v25 = vpop.eup %1166 }
 0x2df   :  { %v773_v29 = vmul.f32 %v1167_v25, %v741_v56 }
 0x2e0   :  { %v1169_v27 = vpop.eup %1168 }
 0x2e1   :  { %v774_v28 = vmul.f32 %v1169_v27, %v742_v1  ;;  %v781_v45 = vmul.f32 0.01, %v773_v29  ;;  %vm777_vm3 = vcmp.gt.f32.partialorder %v773_v29, 0.0 }
 0x2e3   :  { %v782_v40 = vmul.f32 0.01, %v774_v28  ;;  %vm778_vm2 = vcmp.gt.f32.partialorder %v774_v28, 0.0  ;;  %v785_v57 = vsel %vm777_vm3, %v773_v29, %v781_v45 }
 0x2e4   :  { %v1171_v30 = vpop.eup %1170 }
 0x2e5   :  { %v1173_v34 = vpop.eup %1172  ;;  %v776_v35 = vmul.f32 %v1171_v30, %v744_v14  ;;  %v786_v48 = vsel %vm778_vm2, %v774_v28, %v782_v40 }
 0x2e6   :  { %v775_v43 = vmul.f32 %v1173_v34, %v743_v41 }
 0x2e7   :  { %vm780_vm4 = vcmp.gt.f32.partialorder %v776_v35, 0.0  ;;  %v784_v46 = vmul.f32 0.01, %v776_v35 }
 0x2e8   :  { %vm779_vm5 = vcmp.gt.f32.partialorder %v775_v43, 0.0  ;;  %v783_v47 = vmul.f32 0.01, %v775_v43 }
 0x2e9   :  { %v788_v55 = vsel %vm780_vm4, %v776_v35, %v784_v46 }
 0x2ea   :  { %v787_v59 = vsel %vm779_vm5, %v775_v43, %v783_v47  ;;  %v797_v61 = vcombine.low %v786_v48, %v788_v55 }
 0x2eb   :  { %v789_v62 = vcombine.low %v785_v57, %v787_v59 }
 0x2ec   :  { %v804_v3 = vrot.slane %v797_v61, %v1621_v53 }
 0x2ed   :  { %v796_v8 = vrot.slane %v789_v62, %v1621_v53 }
 0x2ef   :  { %v806_v13 = vcombine.high %v796_v8, %v804_v3  ;;  %v805_v19 = vcombine.low %v796_v8, %v804_v3 }
 0x2f1   :  { %v820_v26 = vrot.slane %v806_v13, %v1624_v63  ;;  %v813_v31 = vrot.slane %v805_v19, %v1624_v63 }
 0x2f3   :  { %828 = vrot.lane.b32.xlu1 %v820_v26, %s1178_s21  ;;  %v821_v32 = vcombine.high %v813_v31, %v1174_v0  ;;  %v822_v37 = vcombine.high %v820_v26, %v1174_v0 }
 0x2f5   :  { %824 = vrot.lane.b32.xlu0 %v821_v32, %s1176_s19 }
 0x2f7   :  { %832 = vrot.lane.b32.xlu1 %v822_v37, %s1177_s20 }
 0x365   :  { %v829_v38 = vpop.permute.xlu1 %828 }
 0x367   :  { %v825_v53 = vpop.permute.xlu0 %824 }
 0x368   :  { %v836_v42 = vsel %vm835_vm6, %v813_v31, %v825_v53 }
 0x369   :  { %v833_v44 = vpop.permute.xlu1 %832  ;;  %v838_v49 = vsel %vm837_vm7, %v836_v42, %v829_v38 }
 0x36a   :  { %v840_v52 = vsel %vm839_vm8, %v838_v49, %v833_v44 }
 0x36b   :  { %841 = vst [vmem:[%s1654_s3] sm:$0xf] %v840_v52 }

</bundles_post_ra>
